<compile_context>
chip_gen: v6e
topology: v6e:2x2x1
jax: 0.10.0
libtpu: 0.0.40
codegen_flags: <defaults>
</compile_context>

<pallas_src>
import functools

import jax
import jax.numpy as jnp
from jax.experimental import pallas as pl
from jax.experimental.pallas import tpu as pltpu

LANE = 128


def _round_up(n, m):
    return ((n + m - 1) // m) * m


# ----------------------------------------------------------------------------- pass 1
def _mlp_heads_kernel(x_ref, w1_ref, b1_ref, w2_ref, b2_ref, wh_ref, bh_ref,
                      heads_ref, sum_ref, *, batch_valid, tile_b):
    """Per batch-tile: fc1/fc2 + fused (value|advantage) head, plus global sum(a)."""
    i = pl.program_id(0)

    @pl.when(i == 0)
    def _init():
        sum_ref[...] = jnp.zeros_like(sum_ref)

    x = x_ref[...]

    h1 = jnp.maximum(
        jnp.dot(x, w1_ref[...], preferred_element_type=jnp.float32) + b1_ref[...], 0.0)
    h2 = jnp.maximum(
        jnp.dot(h1, w2_ref[...], preferred_element_type=jnp.float32) + b2_ref[...], 0.0)

    # Fused heads: column 0 = relu(head_v), columns 1..A = relu(head_a), rest exact 0.
    heads = jnp.maximum(
        jnp.dot(h2, wh_ref[...], preferred_element_type=jnp.float32) + bh_ref[...], 0.0)
    heads_ref[...] = heads

    # Accumulate sum of the advantage stream over VALID rows only (batch was padded
    # to a tile multiple). Column 0 (value) is excluded; padded columns are already 0.
    row = jax.lax.broadcasted_iota(jnp.int32, heads.shape, 0) + i * tile_b
    col = jax.lax.broadcasted_iota(jnp.int32, heads.shape, 1)
    mask = jnp.logical_and(row < batch_valid, col >= 1).astype(jnp.float32)
    sum_ref[...] += jnp.sum(heads * mask, keepdims=True)


# ----------------------------------------------------------------------------- pass 2
def _combine_kernel(heads_ref, sum_ref, q_ref, *, inv_count):
    """Q = v + (a - mean_a), lane-dense; real Q lives in columns 1..A."""
    heads = heads_ref[...]
    mean_a = sum_ref[...] * inv_count          # (1, 1), broadcasts over the tile
    v = heads[:, 0:1]                          # (tile_b, 1) value column
    q_ref[...] = v + (heads - mean_a)


# ----------------------------------------------------------------------------- wrapper
def dueling_q_forward(x, params, *, tile_b=128):
    """x: (B, state_size) float32. params: dict of (in, out)-layout weights/biases."""
    B, S = x.shape
    H1 = params["w1"].shape[1]
    H2 = params["w2"].shape[1]
    A = params["wa"].shape[1]
    Hpad = pl.cdiv(1 + A, LANE) * LANE                     # lane-dense head width

    # Fuse + zero-pad the two heads into one (H2, Hpad) matmul operand.
    w_heads = jnp.concatenate([params["wv"], params["wa"]], axis=1)      # (H2, 1+A)
    b_heads = jnp.concatenate([params["bv"], params["ba"]], axis=1)      # (1, 1+A)
    w_heads = jnp.pad(w_heads, ((0, 0), (0, Hpad - (1 + A))))
    b_heads = jnp.pad(b_heads, ((0, 0), (0, Hpad - (1 + A))))

    # Batch tiling: pad B up to a multiple of the tile (padded rows masked from mean).
    tb = min(tile_b, _round_up(B, 8))
    Bp = _round_up(B, tb)
    nb = Bp // tb
    if Bp != B:
        x = jnp.pad(x, ((0, Bp - B), (0, 0)))

    # VMEM/step: weights ~29 KiB resident + 2x(tb,S) + 2x(tb,Hpad) buffers << 32 MiB.
    cparams_p1 = pltpu.CompilerParams(
        dimension_semantics=("arbitrary",),   # global-sum accumulator couples tiles
        vmem_limit_bytes=32 * 1024 * 1024,
    )
    cparams_p2 = pltpu.CompilerParams(
        dimension_semantics=("parallel",),    # tiles independent once mean is known
        vmem_limit_bytes=32 * 1024 * 1024,
    )

    # ---- pass 1: batch-tiled MLP + fused heads, global sum(a) accumulator ----
    kernel1 = functools.partial(_mlp_heads_kernel, batch_valid=B, tile_b=tb)
    heads, a_sum = pl.pallas_call(
        kernel1,
        grid=(nb,),
        in_specs=[
            pl.BlockSpec((tb, S), lambda i: (i, 0)),       # x: streamed per tile
            pl.BlockSpec((S, H1), lambda i: (0, 0)),       # weights: VMEM-resident
            pl.BlockSpec((1, H1), lambda i: (0, 0)),
            pl.BlockSpec((H1, H2), lambda i: (0, 0)),
            pl.BlockSpec((1, H2), lambda i: (0, 0)),
            pl.BlockSpec((H2, Hpad), lambda i: (0, 0)),
            pl.BlockSpec((1, Hpad), lambda i: (0, 0)),
        ],
        out_specs=(
            pl.BlockSpec((tb, Hpad), lambda i: (i, 0)),    # lane-dense heads output
            pl.BlockSpec((1, 1), lambda i: (0, 0)),        # resident sum accumulator
        ),
        out_shape=(
            jax.ShapeDtypeStruct((Bp, Hpad), jnp.float32),
            jax.ShapeDtypeStruct((1, 1), jnp.float32),
        ),
        compiler_params=cparams_p1,
    )(x, params["w1"], params["b1"], params["w2"], params["b2"], w_heads, b_heads)

    # ---- pass 2: broadcast the global mean, emit Q (lane-dense) ----
    kernel2 = functools.partial(_combine_kernel, inv_count=1.0 / float(B * A))
    q_pad = pl.pallas_call(
        kernel2,
        grid=(nb,),
        in_specs=[
            pl.BlockSpec((tb, Hpad), lambda i: (i, 0)),
            pl.BlockSpec((1, 1), lambda i: (0, 0)),
        ],
        out_specs=pl.BlockSpec((tb, Hpad), lambda i: (i, 0)),
        out_shape=jax.ShapeDtypeStruct((Bp, Hpad), jnp.float32),
        compiler_params=cparams_p2,
    )(heads, a_sum)

    # Advantage/Q columns live at 1..A; rows beyond B are padding.
    return q_pad[:B, 1:1 + A]


# ----------------------------------------------------------------------------- init / reference
def init_params(key, state_size, action_size):
    """Deterministic init mimicking PyTorch Linear default (uniform +/-1/sqrt(fan_in))."""
    def linear(k, fan_in, fan_out):
        kw, kb = jax.random.split(k)
        bound = 1.0 / jnp.sqrt(float(fan_in))
        w = jax.random.uniform(kw, (fan_in, fan_out), jnp.float32, -bound, bound)
        b = jax.random.uniform(kb, (1, fan_out), jnp.float32, -bound, bound)
        return w, b

    k1, k2, k3, k4 = jax.random.split(key, 4)
    w1, b1 = linear(k1, state_size, 64)
    w2, b2 = linear(k2, 64, 32)
    wv, bv = linear(k3, 32, 1)
    wa, ba = linear(k4, 32, action_size)
    return dict(w1=w1, b1=b1, w2=w2, b2=b2, wv=wv, bv=bv, wa=wa, ba=ba)


def reference_forward(x, p):
    """Pure-JAX reference matching the PyTorch forward."""
    h1 = jnp.maximum(x @ p["w1"] + p["b1"], 0.0)
    h2 = jnp.maximum(h1 @ p["w2"] + p["b2"], 0.0)
    a = jnp.maximum(h2 @ p["wa"] + p["ba"], 0.0)
    v = jnp.maximum(h2 @ p["wv"] + p["bv"], 0.0)
    return v + (a - jnp.mean(a))


if __name__ == "__main__":
    key = jax.random.PRNGKey(0)
    kx, kp = jax.random.split(key)

    state_size, action_size = 16, 4
    params = init_params(kp, state_size, action_size)

    # Multi-tile batch (exercises the grid, batch padding and the global-mean mask).
    batch = 200
    x = jax.random.normal(kx, (batch, state_size), jnp.float32)
    q = jax.block_until_ready(dueling_q_forward(x, params, tile_b=128))
    q_ref = reference_forward(x, params)
    assert q.shape == (batch, action_size)
    assert jnp.allclose(q, q_ref, atol=1e-4, rtol=1e-4), "mismatch vs reference (multi-tile)"

    # Tiny batch (single tile path).
    x_small = jax.random.normal(kx, (8, state_size), jnp.float32)
    q_small = jax.block_until_ready(dueling_q_forward(x_small, params, tile_b=128))
    q_small_ref = reference_forward(x_small, params)
    assert q_small.shape == (8, action_size)
    assert jnp.allclose(q_small, q_small_ref, atol=1e-4, rtol=1e-4), "mismatch vs reference (small)"

    print("KERNEL_OK")
</pallas_src>

<mosaic_0001>
module attributes {stable_mosaic.version = 11 : i64} {
  func.func @_mlp_heads_kernel(%arg0: i32, %arg1: memref<128x16xf32, #tpu.memory_space<vmem>>, %arg2: memref<16x64xf32, #tpu.memory_space<vmem>>, %arg3: memref<1x64xf32, #tpu.memory_space<vmem>>, %arg4: memref<64x32xf32, #tpu.memory_space<vmem>>, %arg5: memref<1x32xf32, #tpu.memory_space<vmem>>, %arg6: memref<32x128xf32, #tpu.memory_space<vmem>>, %arg7: memref<1x128xf32, #tpu.memory_space<vmem>>, %arg8: memref<128x128xf32, #tpu.memory_space<vmem>>, %arg9: memref<1x1xf32, #tpu.memory_space<vmem>>) attributes {dimension_semantics = [#tpu.dimension_semantics<arbitrary>], iteration_bounds = array<i64: 2>, scalar_prefetch = 0 : i64, scratch_operands = 0 : i64, tpu.core_type = #tpu.core_type<tc>, window_params = [{transform_indices = @transform_0, window_bounds = array<i64: 128, 16>}, {pipeline_mode = #tpu.pipeline_mode<synchronous>, transform_indices = @transform_1, window_bounds = array<i64: 16, 64>}, {pipeline_mode = #tpu.pipeline_mode<synchronous>, transform_indices = @transform_2, window_bounds = array<i64: 1, 64>}, {pipeline_mode = #tpu.pipeline_mode<synchronous>, transform_indices = @transform_3, window_bounds = array<i64: 64, 32>}, {pipeline_mode = #tpu.pipeline_mode<synchronous>, transform_indices = @transform_4, window_bounds = array<i64: 1, 32>}, {pipeline_mode = #tpu.pipeline_mode<synchronous>, transform_indices = @transform_5, window_bounds = array<i64: 32, 128>}, {pipeline_mode = #tpu.pipeline_mode<synchronous>, transform_indices = @transform_6, window_bounds = array<i64: 1, 128>}, {transform_indices = @transform_7, window_bounds = array<i64: 128, 128>}, {pipeline_mode = #tpu.pipeline_mode<synchronous>, transform_indices = @transform_8, window_bounds = array<i64: 1, 1>}]} {
    %c0_i32 = arith.constant 0 : i32
    %0 = arith.cmpi eq, %arg0, %c0_i32 : i32
    %1 = arith.extui %0 : i1 to i32
    %c0_i32_0 = arith.constant 0 : i32
    %2 = arith.cmpi ne, %1, %c0_i32_0 : i32
    scf.if %2 {
      %cst_26 = arith.constant 0.000000e+00 : f32
      %47 = vector.broadcast %cst_26 : f32 to vector<1x1xf32>
      %c0_27 = arith.constant 0 : index
      %c0_28 = arith.constant 0 : index
      %48 = vector.load %arg9[%c0_27, %c0_28] : memref<1x1xf32, #tpu.memory_space<vmem>>, vector<1x1xf32>
      tpu.vector_store %arg9[%c0_27, %c0_28], %47 {strides = array<i32>} : memref<1x1xf32, #tpu.memory_space<vmem>>, vector<1x1xf32>,
    } else {
    }
    %c0 = arith.constant 0 : index
    %c0_1 = arith.constant 0 : index
    %3 = vector.load %arg1[%c0, %c0_1] : memref<128x16xf32, #tpu.memory_space<vmem>>, vector<128x16xf32>
    %c0_2 = arith.constant 0 : index
    %c0_3 = arith.constant 0 : index
    %4 = vector.load %arg2[%c0_2, %c0_3] : memref<16x64xf32, #tpu.memory_space<vmem>>, vector<16x64xf32>
    %cst = arith.constant dense<0.000000e+00> : vector<128x64xf32>
    %5 = tpu.matmul %3, %4, %cst {dimension_numbers = #tpu.dot_dimension_numbers<[1], [0], [0], [1], [0, 0, 1, 1], [], []>} : vector<128x16xf32>, vector<16x64xf32>, vector<128x64xf32> -> vector<128x64xf32>
    %c0_4 = arith.constant 0 : index
    %c0_5 = arith.constant 0 : index
    %6 = vector.load %arg3[%c0_4, %c0_5] : memref<1x64xf32, #tpu.memory_space<vmem>>, vector<1x64xf32>
    %7 = vector.broadcast %6 : vector<1x64xf32> to vector<128x64xf32>
    %8 = arith.addf %5, %7 : vector<128x64xf32>
    %cst_6 = arith.constant 0.000000e+00 : f32
    %9 = vector.broadcast %cst_6 : f32 to vector<128x64xf32>
    %10 = arith.maximumf %8, %9 : vector<128x64xf32>
    %c0_7 = arith.constant 0 : index
    %c0_8 = arith.constant 0 : index
    %11 = vector.load %arg4[%c0_7, %c0_8] : memref<64x32xf32, #tpu.memory_space<vmem>>, vector<64x32xf32>
    %cst_9 = arith.constant dense<0.000000e+00> : vector<128x32xf32>
    %12 = tpu.matmul %10, %11, %cst_9 {dimension_numbers = #tpu.dot_dimension_numbers<[1], [0], [0], [1], [0, 0, 1, 1], [], []>} : vector<128x64xf32>, vector<64x32xf32>, vector<128x32xf32> -> vector<128x32xf32>
    %c0_10 = arith.constant 0 : index
    %c0_11 = arith.constant 0 : index
    %13 = vector.load %arg5[%c0_10, %c0_11] : memref<1x32xf32, #tpu.memory_space<vmem>>, vector<1x32xf32>
    %14 = vector.broadcast %13 : vector<1x32xf32> to vector<128x32xf32>
    %15 = arith.addf %12, %14 : vector<128x32xf32>
    %cst_12 = arith.constant 0.000000e+00 : f32
    %16 = vector.broadcast %cst_12 : f32 to vector<128x32xf32>
    %17 = arith.maximumf %15, %16 : vector<128x32xf32>
    %c0_13 = arith.constant 0 : index
    %c0_14 = arith.constant 0 : index
    %18 = vector.load %arg6[%c0_13, %c0_14] : memref<32x128xf32, #tpu.memory_space<vmem>>, vector<32x128xf32>
    %cst_15 = arith.constant dense<0.000000e+00> : vector<128x128xf32>
    %19 = tpu.matmul %17, %18, %cst_15 {dimension_numbers = #tpu.dot_dimension_numbers<[1], [0], [0], [1], [0, 0, 1, 1], [], []>} : vector<128x32xf32>, vector<32x128xf32>, vector<128x128xf32> -> vector<128x128xf32>
    %c0_16 = arith.constant 0 : index
    %c0_17 = arith.constant 0 : index
    %20 = vector.load %arg7[%c0_16, %c0_17] : memref<1x128xf32, #tpu.memory_space<vmem>>, vector<1x128xf32>
    %21 = vector.broadcast %20 : vector<1x128xf32> to vector<128x128xf32>
    %22 = arith.addf %19, %21 : vector<128x128xf32>
    %cst_18 = arith.constant 0.000000e+00 : f32
    %23 = vector.broadcast %cst_18 : f32 to vector<128x128xf32>
    %24 = arith.maximumf %22, %23 : vector<128x128xf32>
    %c0_19 = arith.constant 0 : index
    %c0_20 = arith.constant 0 : index
    %25 = vector.load %arg8[%c0_19, %c0_20] : memref<128x128xf32, #tpu.memory_space<vmem>>, vector<128x128xf32>
    tpu.vector_store %arg8[%c0_19, %c0_20], %24 {strides = array<i32>} : memref<128x128xf32, #tpu.memory_space<vmem>>, vector<128x128xf32>,
    %26 = tpu.iota {dimensions = array<i32: 0>} : vector<128x128xi32>
    %c128_i32 = arith.constant 128 : i32
    %27 = arith.muli %arg0, %c128_i32 : i32
    %28 = vector.broadcast %27 : i32 to vector<128x128xi32>
    %29 = arith.addi %26, %28 : vector<128x128xi32>
    %30 = tpu.iota {dimensions = array<i32: 1>} : vector<128x128xi32>
    %c200_i32 = arith.constant 200 : i32
    %31 = vector.broadcast %c200_i32 : i32 to vector<128x128xi32>
    %32 = arith.cmpi slt, %29, %31 : vector<128x128xi32>
    %c1_i32 = arith.constant 1 : i32
    %33 = vector.broadcast %c1_i32 : i32 to vector<128x128xi32>
    %34 = arith.cmpi sge, %30, %33 : vector<128x128xi32>
    %35 = arith.andi %32, %34 : vector<128x128xi1>
    %36 = arith.extui %35 : vector<128x128xi1> to vector<128x128xi32>
    %37 = arith.sitofp %36 : vector<128x128xi32> to vector<128x128xf32>
    %c0_21 = arith.constant 0 : index
    %c0_22 = arith.constant 0 : index
    %38 = vector.load %arg9[%c0_21, %c0_22] : memref<1x1xf32, #tpu.memory_space<vmem>>, vector<1x1xf32>
    %39 = arith.mulf %24, %37 : vector<128x128xf32>
    %40 = vector.shape_cast %39 : vector<128x128xf32> to vector<1x128x128xf32>
    %cst_23 = arith.constant dense<0.000000e+00> : vector<1xf32>
    %41 = vector.multi_reduction <add>, %40, %cst_23 [1, 2] : vector<1x128x128xf32> to vector<1xf32>
    %42 = vector.shape_cast %41 : vector<1xf32> to vector<1x1x1xf32>
    %43 = vector.extract %42[0, 0, 0] : f32 from vector<1x1x1xf32>
    %44 = vector.broadcast %43 : f32 to vector<1x1xf32>
    %45 = arith.addf %38, %44 : vector<1x1xf32>
    %c0_24 = arith.constant 0 : index
    %c0_25 = arith.constant 0 : index
    %46 = vector.load %arg9[%c0_24, %c0_25] : memref<1x1xf32, #tpu.memory_space<vmem>>, vector<1x1xf32>
    tpu.vector_store %arg9[%c0_24, %c0_25], %45 {strides = array<i32>} : memref<1x1xf32, #tpu.memory_space<vmem>>, vector<1x1xf32>,
    return
  }
  func.func @transform_0(%arg0: i32) -> (i32, i32) {
    %c0_i32 = arith.constant 0 : i32
    %c0_i32_0 = arith.constant 0 : i32
    return %arg0, %c0_i32 : i32, i32
  }
  func.func @transform_1(%arg0: i32) -> (i32, i32) {
    %c0_i32 = arith.constant 0 : i32
    %c0_i32_0 = arith.constant 0 : i32
    %c0_i32_1 = arith.constant 0 : i32
    return %c0_i32, %c0_i32_0 : i32, i32
  }
  func.func @transform_2(%arg0: i32) -> (i32, i32) {
    %c0_i32 = arith.constant 0 : i32
    %c0_i32_0 = arith.constant 0 : i32
    %c0_i32_1 = arith.constant 0 : i32
    return %c0_i32, %c0_i32_0 : i32, i32
  }
  func.func @transform_3(%arg0: i32) -> (i32, i32) {
    %c0_i32 = arith.constant 0 : i32
    %c0_i32_0 = arith.constant 0 : i32
    %c0_i32_1 = arith.constant 0 : i32
    return %c0_i32, %c0_i32_0 : i32, i32
  }
  func.func @transform_4(%arg0: i32) -> (i32, i32) {
    %c0_i32 = arith.constant 0 : i32
    %c0_i32_0 = arith.constant 0 : i32
    %c0_i32_1 = arith.constant 0 : i32
    return %c0_i32, %c0_i32_0 : i32, i32
  }
  func.func @transform_5(%arg0: i32) -> (i32, i32) {
    %c0_i32 = arith.constant 0 : i32
    %c0_i32_0 = arith.constant 0 : i32
    %c0_i32_1 = arith.constant 0 : i32
    return %c0_i32, %c0_i32_0 : i32, i32
  }
  func.func @transform_6(%arg0: i32) -> (i32, i32) {
    %c0_i32 = arith.constant 0 : i32
    %c0_i32_0 = arith.constant 0 : i32
    %c0_i32_1 = arith.constant 0 : i32
    return %c0_i32, %c0_i32_0 : i32, i32
  }
  func.func @transform_7(%arg0: i32) -> (i32, i32) {
    %c0_i32 = arith.constant 0 : i32
    %c0_i32_0 = arith.constant 0 : i32
    return %arg0, %c0_i32 : i32, i32
  }
  func.func @transform_8(%arg0: i32) -> (i32, i32) {
    %c0_i32 = arith.constant 0 : i32
    %c0_i32_0 = arith.constant 0 : i32
    %c0_i32_1 = arith.constant 0 : i32
    return %c0_i32, %c0_i32_0 : i32, i32
  }
}

</mosaic_0001>

<bundles_post_ra>
// kernel: tpu_custom_call.1
= control target key start
LH: loop header
LB: loop body
LE: loop exit
PB: predicated region body
PF: predicated region fallthrough
CT: control target
= control target key end

     0   :  { %14 = vsyncpa [#allocation3], 0  ;;  %s2071_s0 = inlined_call_operand.vmem [shape: f32[256,16], index: 0, kind: input, shape index: {}]   ;;  %s2072_s1 = inlined_call_operand.vmem [shape: f32[16,64], index: 1, kind: input, shape index: {}]   ;;  %s2073_s2 = inlined_call_operand.vmem [shape: f32[1,64], index: 2, kind: input, shape index: {}]   ;;  %s2074_s3 = inlined_call_operand.vmem [shape: f32[64,32], index: 3, kind: input, shape index: {}]   ;;  %s2075_s4 = inlined_call_operand.vmem [shape: f32[1,32], index: 4, kind: input, shape index: {}]   ;;  %s2076_s5 = inlined_call_operand.vmem [shape: f32[32,128], index: 5, kind: input, shape index: {}]   ;;  %s2077_s6 = inlined_call_operand.vmem [shape: f32[1,128], index: 6, kind: input, shape index: {}]   ;;  %s2078_s7 = inlined_call_operand.hbm [shape: f32[256,128], index: 7, kind: output, shape index: {0}]   ;;  %s2079_s8 = inlined_call_operand.hbm [shape: f32[1,1], index: 8, kind: output, shape index: {1}]  }
   0x1   :  { %16 = vsyncpa [#allocation3 + $0x1], 0 }
   0x2   :  { %17 = vsyncpa [#allocation5], 0  ;;  %s1697_s27 = smov 0   ;;  %s1699_s28 = smov 0  }
   0x3   :  { %s1701_s29 = smov 0   ;;  %s1703_s30 = smov 0  }
   0x4 LB: > { %s1718_s9 = sadd.s32 4294967295, %s1644_s30   ;;  %s1254_s10 = sadd.s32 4294967294, %s1644_s30   ;;  %s1644_s30 = sphi %s1703_s30, %s2085_s30   ;;  %s1640_s29 = sphi %s1701_s29, %s2084_s29   ;;  %s1636_s28 = sphi %s1699_s28, %s2083_s28   ;;  %s1632_s27 = sphi %s1697_s27, %s2082_s27  }
   0x5   : > { %s1722_s11 = sadd.s32 1, %s1644_s30   ;;  %s182_s12 = sadd.s32 1, %s1640_s29 }
   0x6   : > { %s179_s13 = ssub.s32 %s1644_s30, %s1722_s11  ;;  %p192_p0 = scmp.ne.s32.totalorder %s1640_s29, %s1636_s28 }
   0x7   : > { %p180_p1 = scmp.eq.s32.totalorder %s179_s13, 0  ;;  %p193_p2 = scmp.eq.s32.totalorder %s1718_s9, 1 }
   0x8   : > { %p198_p3 = scmp.ne.s32.totalorder %s1636_s28, %s1632_s27  ;;  %p199_p4 = scmp.eq.s32.totalorder %s1254_s10, 1 }
   0x9   : > { %s1733_s14 = scalar_select %p180_p1, %s1640_s29, %s182_s12  }
   0xa   : > { %p1737_p5 = por %p193_p2, %p192_p0  ;;  %p1741_p6 = por %p199_p4, %p198_p3 }
   0xb   : > { %p1257_p7 = scmp.ge.s32.totalorder %s1644_s30, 1  ;;  %p265_p8 = scmp.lt.s32.totalorder %s1644_s30, 3 }
   0xd   : > { %p266_p9 = pnand %p1257_p7, %p265_p8 }
   0xe   : > { %s294_s17 = sand.u32 (!%p266_p9), 1, %s1636_s28   ;;  %s1259_s18 = sshll.u32 (!%p266_p9), %s1718_s9, 4 }
   0xf   : > { %269 = sbr.rel (%p266_p9) target bundleno = 873 (0x369), region = 48  ;;  %s1258_s19 = sshll.u32 (!%p266_p9), %s294_s17, 7 }
  0x10   : > { %p300_p10 = scmp.lt.s32.totalorder (!%p266_p9), %s1259_s18, 31  ;;  %s1756_s24 = scalar_lea.vmem (!%p266_p9), [#allocation2], %s1258_s19 }
  0x11   : > { %p1261_p11 = scmp.ne.s32.totalorder (!%p266_p9), %s1718_s9, 0 }
  0x14   : > { %s2087_s18 = smov (!%p300_p10, %s1259_s18), 31  ;;  %309 = sbr.rel (%p1261_p11) target bundleno = 27 (0x1b), region = 52 }
  0x15   : > { %s1260_s20 = sshll.u32 %s2087_s18, 3 }
  0x16   : > { %s1754_s23 = scalar_lea.vmem %s2071_s0, %s1260_s20 }
  0x19   : > { %vm310_vm0 = vcmask 0   ;;  %v1646_v0 = vmov 0.0  }
  0x1a   : > { %311 = vst.msk [vmem:[#allocation4] sm:$0x1] %vm310_vm0, %v1646_v0 }
  0x1b PF: > { %v329_v1 = vld [vmem:[%s2072_s1 + $0x8] sm:$0xff]  ;;  %v328_v2 = vld [vmem:[%s2072_s1] sm:$0xff]  ;;  %vm337_vm1 = vcmask 130048   ;;  %v314_v5 = vld [vmem:[%s1754_s23 + $0x10] sm:$0xff]  ;;  %vm562_vm2 = vcmask 523264   ;;  %vm783_vm3 = vcmask 261120  }
  0x1c   : > { %v312_v3 = vld [vmem:[%s1754_s23] sm:$0xff]  ;;  %1400 = vmatprep.subr.mxu0 %v329_v1  ;;  %v313_v4 = vld [vmem:[%s1754_s23 + $0x8] sm:$0xff]  ;;  %1500 = vmatprep.subr.mxu1 %v329_v1  ;;  %v322_v8 = vld [vmem:[%s1754_s23 + $0x50] sm:$0xff]  ;;  %s1313_s25 = sshll.u32 %s1718_s9, 7  ;;  %s1337_s12 = sshll.u32 %s1718_s9, 11 }
  0x1d   : > { %1404 = vmatprep.mubr.msk.f32.mxu0 %vm337_vm1, %v312_v3  ;;  %1401 = vmatpush3.msra.mxu0 %v329_v1  ;;  %v320_v6 = vld [vmem:[%s1754_s23 + $0x40] sm:$0xff]  ;;  %v321_v7 = vld [vmem:[%s1754_s23 + $0x48] sm:$0xff]  ;;  %v315_v9 = vld [vmem:[%s1754_s23 + $0x18] sm:$0xff]  ;;  %s2013_s19 = scalar_lea.hbm %s2078_s7, %s1337_s12  ;;  %s1170_s20 = sshll.u32 %s1756_s24, 4  ;;  %s2016_s20 = int_to_ptr.vmem [resolvable:$true] %s1170_s20 }
  0x1e   : > { %1402 = vmatprep.subr.mxu0 %v328_v2  ;;  %1502 = vmatpush3.msra.mxu1 %v329_v1  ;;  %v554_v10 = vld [vmem:[%s2074_s3 + $0x38] sm:$0xff]  ;;  %v553_v11 = vld [vmem:[%s2074_s3 + $0x30] sm:$0xff]  ;;  %v316_v12 = vld [vmem:[%s1754_s23 + $0x20] sm:$0xff]  ;;  %s2020_s21 = scalar_lea.sflag [#allocation3], %s294_s17  ;;  %s1556_s22 = scalar_lea.vmem %s2016_s20, 2048 }
  0x1f   : > { %1403 = vmatpush3.msra.mxu0 %v328_v2  ;;  %1501 = vmatprep.subr.mxu1 %v328_v2  ;;  %v323_v13 = vld [vmem:[%s1754_s23 + $0x58] sm:$0xff]  ;;  %v552_v14 = vld [vmem:[%s2074_s3 + $0x28] sm:$0xff]  ;;  %v324_v15 = vld [vmem:[%s1754_s23 + $0x60] sm:$0xff]  ;;  %p1557_p12 = scmp.ne.s32.totalorder %s2016_s20, %s1556_s22 }
  0x20   : > { %1405 = vmatmul.mubr.msk.f32.vlgmr.msra.gmra.mxu0 %vm337_vm1, %v313_v4  ;;  %1503 = vmatpush3.msra.mxu1 %v328_v2  ;;  %v317_v16 = vld [vmem:[%s1754_s23 + $0x28] sm:$0xff]  ;;  %v551_v17 = vld [vmem:[%s2074_s3 + $0x20] sm:$0xff]  ;;  %v318_v18 = vld [vmem:[%s1754_s23 + $0x30] sm:$0xff] }
  0x21   : > { %1407 = vmatprep.mubr.msk.f32.mxu0 %vm337_vm1, %v314_v5  ;;  %1416 = vmatprep.mubr.msk.f32.mxu1 %vm337_vm1, %v320_v6  ;;  %v325_v19 = vld [vmem:[%s1754_s23 + $0x68] sm:$0xff]  ;;  %v550_v20 = vld [vmem:[%s2074_s3 + $0x18] sm:$0xff]  ;;  %v326_v21 = vld [vmem:[%s1754_s23 + $0x70] sm:$0xff]  ;;  %p1558_p13 = pnand %p1557_p12, %p1737_p5 }
  0x22   : > { %1417 = vmatmul.mubr.msk.f32.vlgmr.msra.gmra.mxu1 %vm337_vm1, %v321_v7  ;;  %1428 = vmatprep.subr.mxu1 %v554_v10  ;;  %v319_v22 = vld [vmem:[%s1754_s23 + $0x38] sm:$0xff]  ;;  %v549_v24 = vld [vmem:[%s2074_s3 + $0x10] sm:$0xff]  ;;  %v548_v25 = vld [vmem:[%s2074_s3 + $0x8] sm:$0xff] }
  0x23   : > { %1419 = vmatprep.mubr.msk.f32.mxu1 %vm337_vm1, %v322_v8  ;;  %1429 = vmatpush3.msra.mxu1 %v554_v10  ;;  %v327_v23 = vld [vmem:[%s1754_s23 + $0x78] sm:$0xff]  ;;  %v547_v26 = vld [vmem:[%s2074_s3] sm:$0xff]  ;;  %v774_v28 = vld [vmem:[%s2076_s5 + $0x10] sm:$0xff]  ;;  %p1559_p0 = pneg %p1558_p13  ;;  %s1648_s23 = smov [#allocation2]  }
  0x24   : > { %1408 = vmatmul.mubr.msk.f32.gmra.mxu0 %vm337_vm1, %v315_v9  ;;  %1430 = vmatprep.subr.mxu1 %v553_v11  ;;  %v775_v27 = vld [vmem:[%s2076_s5 + $0x18] sm:$0xff]  ;;  %v773_v29 = vld [vmem:[%s2076_s5 + $0x8] sm:$0xff]  ;;  %v1262_v30 = vld [vmem:[%s2073_s2] ss:$0 sm:$0xff] }
  0x25   : > { %1410 = vmatprep.mubr.msk.f32.mxu0 %vm337_vm1, %v316_v12  ;;  %1431 = vmatpush3.msra.mxu1 %v553_v11 }
  0x26   : > { %1420 = vmatmul.mubr.msk.f32.gmra.mxu1 %vm337_vm1, %v323_v13  ;;  %1432 = vmatprep.subr.mxu1 %v552_v14 }
  0x27   : > { %1422 = vmatprep.mubr.msk.f32.mxu1 %vm337_vm1, %v324_v15  ;;  %1433 = vmatpush3.msra.mxu1 %v552_v14  ;;  %v772_v15 = vld [vmem:[%s2076_s5] sm:$0xff] }
  0x28   : > { %1411 = vmatmul.mubr.msk.f32.gmra.mxu0 %vm337_vm1, %v317_v16  ;;  %1434 = vmatprep.subr.mxu1 %v551_v17  ;;  %v1279_v16 = vld [vmem:[%s2075_s4] ss:$0 sm:$0xff] }
  0x29   : > { %1413 = vmatprep.mubr.msk.f32.mxu0 %vm337_vm1, %v318_v18  ;;  %1435 = vmatpush3.msra.mxu1 %v551_v17 }
  0x2a   : > { %1423 = vmatmul.mubr.msk.f32.gmra.mxu1 %vm337_vm1, %v325_v19  ;;  %1436 = vmatprep.subr.mxu1 %v550_v20 }
  0x2b   : > { %1425 = vmatprep.mubr.msk.f32.mxu1 %vm337_vm1, %v326_v21  ;;  %1437 = vmatpush3.msra.mxu1 %v550_v20 }
  0x2c   : > { %1414 = vmatmul.mubr.msk.f32.gmra.mxu0 %vm337_vm1, %v319_v22  ;;  %1438 = vmatprep.subr.mxu1 %v549_v24 }
  0x2d   : > { %1439 = vmatpush3.msra.mxu1 %v549_v24  ;;  %1468 = vmatprep.subr.mxu0 %v775_v27 }
  0x2e   : > { %1426 = vmatmul.mubr.msk.f32.gmra.mxu1 %vm337_vm1, %v327_v23  ;;  %1440 = vmatprep.subr.mxu1 %v548_v25 }
  0x2f   : > { %1441 = vmatpush3.msra.mxu1 %v548_v25  ;;  %1469 = vmatpush3.msra.mxu0 %v775_v27 }
  0x30   : > { %1442 = vmatprep.subr.mxu1 %v547_v26  ;;  %1470 = vmatprep.subr.mxu0 %v774_v28 }
  0x31   : > { %1443 = vmatpush3.msra.mxu1 %v547_v26  ;;  %1471 = vmatpush3.msra.mxu0 %v774_v28 }
  0x32   : > { %1472 = vmatprep.subr.mxu0 %v773_v29 }
  0x33   : > { %1473 = vmatpush3.msra.mxu0 %v773_v29 }
  0x34   : > { %1474 = vmatprep.subr.mxu0 %v772_v15 }
  0x35   : > { %1475 = vmatpush3.msra.mxu0 %v772_v15 }
  0xe0   : > { %v1406_v31 = vpop.f32.mrf.mxu0 }
  0xe1   : > { %v458_v32 = vadd.f32 %v1406_v31, %v1262_v30 }
  0xe2   : > { %v452_v33 = vpop.f32.mrf.mxu0  ;;  %v1418_v34 = vpop.f32.mrf.mxu1 }
  0xe3   : > { %v453_v35 = vadd.f32 %v1262_v30, %v452_v33  ;;  %v532_v39 = vmax.f32 %v458_v32, 0.0  ;;  %v498_v0 = vadd.f32 %v1418_v34, %v1262_v30 }
  0xe4   : > { %v1409_v36 = vpop.f32.mrf.mxu0  ;;  %v492_v37 = vpop.f32.mrf.mxu1 }
  0xe5   : > { %v531_v38 = vmax.f32 %v453_v35, 0.0  ;;  %v468_v40 = vadd.f32 %v1409_v36, %v1262_v30  ;;  %v493_v54 = vadd.f32 %v1262_v30, %v492_v37  ;;  %v540_v4 = vmax.f32 %v498_v0, 0.0 }
  0xe6   : > { %v462_v41 = vpop.f32.mrf.mxu0  ;;  %v1421_v42 = vpop.f32.mrf.mxu1 }
  0xe7   : > { %v463_v43 = vadd.f32 %v1262_v30, %v462_v41  ;;  %1444 = vmatprep.mubr.msk.f32.mxu1 %vm562_vm2, %v531_v38  ;;  %v534_v47 = vmax.f32 %v468_v40, 0.0  ;;  %v539_v61 = vmax.f32 %v493_v54, 0.0  ;;  %v508_v5 = vadd.f32 %v1421_v42, %v1262_v30 }
  0xe8   : > { %v1412_v44 = vpop.f32.mrf.mxu0  ;;  %1445 = vmatmul.mubr.msk.f32.vlgmr.msra.gmra.mxu1 %vm562_vm2, %v532_v39  ;;  %v502_v45 = vpop.f32.mrf.mxu1 }
  0xe9   : > { %v533_v46 = vmax.f32 %v463_v43, 0.0  ;;  %v478_v48 = vadd.f32 %v1412_v44, %v1262_v30  ;;  %v503_v62 = vadd.f32 %v1262_v30, %v502_v45  ;;  %v542_v9 = vmax.f32 %v508_v5, 0.0 }
  0xea   : > { %v472_v49 = vpop.f32.mrf.mxu0  ;;  %v1424_v50 = vpop.f32.mrf.mxu1 }
  0xeb   : > { %v473_v51 = vadd.f32 %v1262_v30, %v472_v49  ;;  %1447 = vmatprep.mubr.msk.f32.mxu1 %vm562_vm2, %v533_v46  ;;  %v536_v55 = vmax.f32 %v478_v48, 0.0  ;;  %v541_v2 = vmax.f32 %v503_v62, 0.0  ;;  %v518_v10 = vadd.f32 %v1424_v50, %v1262_v30 }
  0xec   : > { %v1415_v52 = vpop.f32.mrf.mxu0  ;;  %1448 = vmatmul.mubr.msk.f32.gmra.mxu1 %vm562_vm2, %v534_v47  ;;  %v512_v58 = vpop.f32.mrf.mxu1 }
  0xed   : > { %v535_v53 = vmax.f32 %v473_v51, 0.0  ;;  %v488_v56 = vadd.f32 %v1415_v52, %v1262_v30  ;;  %v513_v3 = vadd.f32 %v1262_v30, %v512_v58  ;;  %v544_v12 = vmax.f32 %v518_v10, 0.0  ;;  %v1887_v10 = vld [vmem:[%s2077_s6] ss:$0 sm:$0xff] }
  0xee   : > { %v482_v57 = vpop.f32.mrf.mxu0  ;;  %v1427_v1 = vpop.f32.mrf.mxu1 }
  0xef   : > { %v483_v59 = vadd.f32 %v1262_v30, %v482_v57  ;;  %1450 = vmatprep.mubr.msk.f32.mxu1 %vm562_vm2, %v535_v53  ;;  %v538_v63 = vmax.f32 %v488_v56, 0.0  ;;  %v543_v7 = vmax.f32 %v513_v3, 0.0  ;;  %v528_v13 = vadd.f32 %v1427_v1, %v1262_v30 }
  0xf0   : > { %1451 = vmatmul.mubr.msk.f32.gmra.mxu1 %vm562_vm2, %v536_v55  ;;  %v522_v6 = vpop.f32.mrf.mxu1  ;;  %v1009_v1 = vlaneseq }
  0xf1   : > { %v537_v60 = vmax.f32 %v483_v59, 0.0  ;;  %v523_v8 = vadd.f32 %v1262_v30, %v522_v6  ;;  %v546_v14 = vmax.f32 %v528_v13, 0.0 }
  0xf3   : > { %1453 = vmatprep.mubr.msk.f32.mxu1 %vm562_vm2, %v537_v60  ;;  %v545_v11 = vmax.f32 %v523_v8, 0.0  ;;  %v1881_v8 = vand.u32 127, %v1009_v1 }
  0xf4   : > { %1454 = vmatmul.mubr.msk.f32.gmra.mxu1 %vm562_vm2, %v538_v63 }
  0xf5   : > { %1456 = vmatprep.mubr.msk.f32.mxu1 %vm562_vm2, %v539_v61  ;;  %vm1062_vm6 = vcmp.ge.s32.totalorder %v1881_v8, 1 }
  0xf8   : > { %1457 = vmatmul.mubr.msk.f32.gmra.mxu1 %vm562_vm2, %v540_v4  ;;  %v1875_v4 = vstv %s1313_s25  ;;  %s1560_s25 = sshll.u32 %s1648_s23, 4  ;;  %s1561_s25 = int_to_ptr.vmem [resolvable:$false] %s1560_s25 }
  0xf9   : > { %1459 = vmatprep.mubr.msk.f32.mxu1 %vm562_vm2, %v541_v2  ;;  %v1871_v2 = vshrl.u32 %v1009_v1, 7  ;;  %s1562_s26 = scalar_lea.vmem %s1561_s25, 4096  ;;  %p1563_p1 = scmp.lt.s32.totalorder %s2016_s20, %s1561_s25 }
  0xfa   : > { %p1564_p3 = scmp.lt.s32.totalorder %s1562_s26, %s1556_s22 }
  0xfb   : > { %v1011_v3 = vadd.s32 8, %v1871_v2  ;;  %v1028_v5 = vadd.s32 %v1875_v4, %v1871_v2  ;;  %v1012_v6 = vadd.s32 16, %v1871_v2  ;;  %v1015_v15 = vadd.s32 40, %v1871_v2 }
  0xfc   : > { %1460 = vmatmul.mubr.msk.f32.gmra.mxu1 %vm562_vm2, %v542_v9  ;;  %v1013_v9 = vadd.s32 24, %v1871_v2  ;;  %p1565_p4 = por %p1564_p3, %p1563_p1 }
  0xfd   : > { %1462 = vmatprep.mubr.msk.f32.mxu1 %vm562_vm2, %v543_v7  ;;  %v1029_v7 = vadd.s32 %v1875_v4, %v1011_v3  ;;  %vm1046_vm4 = vcmp.lt.s32.totalorder %v1028_v5, 200 }
  0xfe   : > { %vm1063_vm7 = vmand %vm1046_vm4, %vm1062_vm6  ;;  %p1566_p7 = pnand %p1565_p4, %p1559_p0 }
  0xff   : > { %vm1047_vm5 = vcmp.lt.s32.totalorder %v1029_v7, 200 }
 0x100   : > { %1463 = vmatmul.mubr.msk.f32.gmra.mxu1 %vm562_vm2, %v544_v12  ;;  %v1014_v12 = vadd.s32 32, %v1871_v2  ;;  %vm1064_vm9 = vmand %vm1047_vm5, %vm1062_vm6 }
 0x101   : > { %1465 = vmatprep.mubr.msk.f32.mxu1 %vm562_vm2, %v545_v11  ;;  %v1030_v11 = vadd.s32 %v1875_v4, %v1012_v6 }
 0x103   : > { %vm1048_vm8 = vcmp.lt.s32.totalorder %v1030_v11, 200 }
 0x104   : > { %1466 = vmatmul.mubr.msk.f32.gmra.mxu1 %vm562_vm2, %v546_v14  ;;  %v1031_v14 = vadd.s32 %v1875_v4, %v1013_v9  ;;  %vm1065_vm11 = vmand %vm1048_vm8, %vm1062_vm6  ;;  %v1023_v9 = vadd.s32 104, %v1871_v2 }
 0x106   : > { %vm1049_vm10 = vcmp.lt.s32.totalorder %v1031_v14, 200 }
 0x107   : > { %vm1066_vm13 = vmand %vm1049_vm10, %vm1062_vm6 }
 0x1a8   : > { %v1446_v17 = vpop.f32.mrf.mxu1 }
 0x1a9   : > { %v683_v18 = vadd.f32 %v1446_v17, %v1279_v16 }
 0x1aa   : > { %v677_v19 = vpop.f32.mrf.mxu1 }
 0x1ab   : > { %v678_v20 = vadd.f32 %v1279_v16, %v677_v19  ;;  %v757_v23 = vmax.f32 %v683_v18, 0.0  ;;  %v1032_v18 = vadd.s32 %v1875_v4, %v1014_v12  ;;  %v1016_v19 = vadd.s32 48, %v1871_v2 }
 0x1ac   : > { %v1449_v21 = vpop.f32.mrf.mxu1 }
 0x1ad   : > { %v756_v22 = vmax.f32 %v678_v20, 0.0  ;;  %v693_v24 = vadd.f32 %v1449_v21, %v1279_v16  ;;  %vm1050_vm12 = vcmp.lt.s32.totalorder %v1032_v18, 200  ;;  %v1024_v18 = vadd.s32 112, %v1871_v2 }
 0x1ae   : > { %v687_v25 = vpop.f32.mrf.mxu1  ;;  %vm1067_vm15 = vmand %vm1050_vm12, %vm1062_vm6 }
 0x1af   : > { %v688_v26 = vadd.f32 %v1279_v16, %v687_v25  ;;  %1476 = vmatprep.mubr.msk.f32.mxu0 %vm783_vm3, %v756_v22  ;;  %v759_v29 = vmax.f32 %v693_v24, 0.0  ;;  %v1647_v22 = vmov 0.0   ;;  %v1033_v25 = vadd.s32 %v1875_v4, %v1015_v15 }
 0x1b0   : > { %v1452_v27 = vpop.f32.mrf.mxu1  ;;  %1477 = vmatmul.mubr.msk.f32.vlgmr.msra.gmra.mxu0 %vm783_vm3, %v757_v23  ;;  %v1314_v23 = vsel %vm1063_vm7, 1.0, %v1647_v22 }
 0x1b1   : > { %v758_v28 = vmax.f32 %v688_v26, 0.0  ;;  %v703_v30 = vadd.f32 %v1452_v27, %v1279_v16  ;;  %v1017_v26 = vadd.s32 56, %v1871_v2  ;;  %vm1051_vm14 = vcmp.lt.s32.totalorder %v1033_v25, 200 }
 0x1b2   : > { %v697_v31 = vpop.f32.mrf.mxu1  ;;  %vm1068_vm1 = vmand %vm1051_vm14, %vm1062_vm6 }
 0x1b3   : > { %v698_v32 = vadd.f32 %v1279_v16, %v697_v31  ;;  %1479 = vmatprep.mubr.msk.f32.mxu0 %vm783_vm3, %v758_v28  ;;  %v761_v35 = vmax.f32 %v703_v30, 0.0  ;;  %v1034_v31 = vadd.s32 %v1875_v4, %v1016_v19 }
 0x1b4   : > { %v1455_v33 = vpop.f32.mrf.mxu1  ;;  %1480 = vmatmul.mubr.msk.f32.gmra.mxu0 %vm783_vm3, %v759_v29  ;;  %v1315_v29 = vsel %vm1064_vm9, 1.0, %v1647_v22 }
 0x1b5   : > { %v760_v34 = vmax.f32 %v698_v32, 0.0  ;;  %v713_v36 = vadd.f32 %v1455_v33, %v1279_v16  ;;  %v1018_v32 = vadd.s32 64, %v1871_v2  ;;  %vm1052_vm0 = vcmp.lt.s32.totalorder %v1034_v31, 200 }
 0x1b6   : > { %v707_v37 = vpop.f32.mrf.mxu1 }
 0x1b7   : > { %v708_v38 = vadd.f32 %v1279_v16, %v707_v37  ;;  %1482 = vmatprep.mubr.msk.f32.mxu0 %vm783_vm3, %v760_v34  ;;  %v763_v41 = vmax.f32 %v713_v36, 0.0  ;;  %v1316_v36 = vsel %vm1065_vm11, 1.0, %v1647_v22 }
 0x1b8   : > { %v1458_v39 = vpop.f32.mrf.mxu1  ;;  %1483 = vmatmul.mubr.msk.f32.gmra.mxu0 %vm783_vm3, %v761_v35 }
 0x1b9   : > { %v762_v40 = vmax.f32 %v708_v38, 0.0  ;;  %v723_v42 = vadd.f32 %v1458_v39, %v1279_v16  ;;  %v1035_v38 = vadd.s32 %v1875_v4, %v1017_v26  ;;  %v1019_v39 = vadd.s32 72, %v1871_v2 }
 0x1ba   : > { %v717_v43 = vpop.f32.mrf.mxu1  ;;  %v1041_v26 = vadd.s32 %v1875_v4, %v1023_v9 }
 0x1bb   : > { %v718_v44 = vadd.f32 %v1279_v16, %v717_v43  ;;  %1485 = vmatprep.mubr.msk.f32.mxu0 %vm783_vm3, %v762_v40  ;;  %v765_v47 = vmax.f32 %v723_v42, 0.0  ;;  %v1317_v43 = vsel %vm1066_vm13, 1.0, %v1647_v22  ;;  %vm1053_vm2 = vcmp.lt.s32.totalorder %v1035_v38, 200 }
 0x1bc   : > { %v1461_v45 = vpop.f32.mrf.mxu1  ;;  %1486 = vmatmul.mubr.msk.f32.gmra.mxu0 %vm783_vm3, %v763_v41  ;;  %vm1070_vm5 = vmand %vm1053_vm2, %vm1062_vm6 }
 0x1bd   : > { %v764_v46 = vmax.f32 %v718_v44, 0.0  ;;  %v733_v48 = vadd.f32 %v1461_v45, %v1279_v16  ;;  %v1036_v45 = vadd.s32 %v1875_v4, %v1018_v32  ;;  %v1321_v15 = vsel %vm1070_vm5, 1.0, %v1647_v22 }
 0x1be   : > { %v727_v49 = vpop.f32.mrf.mxu1 }
 0x1bf   : > { %v728_v50 = vadd.f32 %v1279_v16, %v727_v49  ;;  %1488 = vmatprep.mubr.msk.f32.mxu0 %vm783_vm3, %v764_v46  ;;  %v767_v53 = vmax.f32 %v733_v48, 0.0  ;;  %v1020_v46 = vadd.s32 80, %v1871_v2  ;;  %vm1054_vm4 = vcmp.lt.s32.totalorder %v1036_v45, 200 }
 0x1c0   : > { %v1464_v51 = vpop.f32.mrf.mxu1  ;;  %1489 = vmatmul.mubr.msk.f32.gmra.mxu0 %vm783_vm3, %v765_v47  ;;  %vm1071_vm8 = vmand %vm1054_vm4, %vm1062_vm6 }
 0x1c1   : > { %v766_v52 = vmax.f32 %v728_v50, 0.0  ;;  %v743_v54 = vadd.f32 %v1464_v51, %v1279_v16  ;;  %v1318_v51 = vsel %vm1067_vm15, 1.0, %v1647_v22  ;;  %vm1059_vm15 = vcmp.lt.s32.totalorder %v1041_v26, 200 }
 0x1c2   : > { %v737_v55 = vpop.f32.mrf.mxu1  ;;  %vm1076_vm2 = vmand %vm1059_vm15, %vm1062_vm6 }
 0x1c3   : > { %v738_v56 = vadd.f32 %v1279_v16, %v737_v55  ;;  %1491 = vmatprep.mubr.msk.f32.mxu0 %vm783_vm3, %v766_v52  ;;  %v769_v59 = vmax.f32 %v743_v54, 0.0  ;;  %v1021_v54 = vadd.s32 88, %v1871_v2 }
 0x1c4   : > { %v1467_v57 = vpop.f32.mrf.mxu1  ;;  %1492 = vmatmul.mubr.msk.f32.gmra.mxu0 %vm783_vm3, %v767_v53  ;;  %v1037_v53 = vadd.s32 %v1875_v4, %v1019_v39 }
 0x1c5   : > { %v768_v58 = vmax.f32 %v738_v56, 0.0  ;;  %v753_v60 = vadd.f32 %v1467_v57, %v1279_v16  ;;  %v1039_v7 = vadd.s32 %v1875_v4, %v1021_v54 }
 0x1c6   : > { %v747_v61 = vpop.f32.mrf.mxu1  ;;  %vm1055_vm7 = vcmp.lt.s32.totalorder %v1037_v53, 200 }
 0x1c7   : > { %v748_v62 = vadd.f32 %v1279_v16, %v747_v61  ;;  %1494 = vmatprep.mubr.msk.f32.mxu0 %vm783_vm3, %v768_v58  ;;  %v771_v0 = vmax.f32 %v753_v60, 0.0  ;;  %v1038_v61 = vadd.s32 %v1875_v4, %v1020_v46  ;;  %vm1072_vm10 = vmand %vm1055_vm7, %vm1062_vm6  ;;  %vm1057_vm11 = vcmp.lt.s32.totalorder %v1039_v7, 200 }
 0x1c8   : > { %1495 = vmatmul.mubr.msk.f32.gmra.mxu0 %vm783_vm3, %v769_v59  ;;  %v1319_v59 = vsel %vm1068_vm1, 1.0, %v1647_v22  ;;  %v1323_v32 = vsel %vm1072_vm10, 1.0, %v1647_v22  ;;  %vm1074_vm14 = vmand %vm1057_vm11, %vm1062_vm6 }
 0x1c9   : > { %v770_v63 = vmax.f32 %v748_v62, 0.0  ;;  %v1022_v62 = vadd.s32 96, %v1871_v2  ;;  %vm1056_vm9 = vcmp.lt.s32.totalorder %v1038_v61, 200  ;;  %v1325_v45 = vsel %vm1074_vm14, 1.0, %v1647_v22 }
 0x1ca   : > { %vm1073_vm12 = vmand %vm1056_vm9, %vm1062_vm6 }
 0x1cb   : > { %1497 = vmatprep.mubr.msk.f32.mxu0 %vm783_vm3, %v770_v63  ;;  %v1324_v38 = vsel %vm1073_vm12, 1.0, %v1647_v22 }
 0x1cc   : > { %1498 = vmatmul.mubr.msk.f32.gmra.mxu0 %vm783_vm3, %v771_v0  ;;  %vm1069_vm3 = vmand %vm1052_vm0, %vm1062_vm6 }
 0x1cd   : > { %v1320_v5 = vsel %vm1069_vm3, 1.0, %v1647_v22 }
 0x270   : > { %v1478_v13 = vpop.f32.mrf.mxu0 }
 0x271   : > { %v904_v16 = vadd.f32 %v1478_v13, %v1887_v10 }
 0x272   : > { %v898_v17 = vpop.f32.mrf.mxu0 }
 0x273   : > { %v978_v20 = vmax.f32 %v904_v16, 0.0  ;;  %v899_v21 = vadd.f32 %v1887_v10, %v898_v17  ;;  %v1040_v17 = vadd.s32 %v1875_v4, %v1022_v62 }
 0x274   : > { %v1481_v24 = vpop.f32.mrf.mxu0 }
 0x275   : > { %994 = vst [vmem:[%s1756_s24 + $0x8] sm:$0xff] %v978_v20  ;;  %v977_v27 = vmax.f32 %v899_v21, 0.0  ;;  %v914_v28 = vadd.f32 %v1481_v24, %v1887_v10  ;;  %v1113_v40 = vmul.f32 %v1315_v29, %v978_v20  ;;  %v1322_v24 = vsel %vm1071_vm8, 1.0, %v1647_v22 }
 0x276   : > { %v908_v30 = vpop.f32.mrf.mxu0  ;;  %vm1058_vm13 = vcmp.lt.s32.totalorder %v1040_v17, 200 }
 0x277   : > { %993 = vst [vmem:[%s1756_s24] sm:$0xff] %v977_v27  ;;  %v1112_v33 = vmul.f32 %v1314_v23, %v977_v27  ;;  %v980_v34 = vmax.f32 %v914_v28, 0.0  ;;  %v909_v35 = vadd.f32 %v1887_v10, %v908_v30  ;;  %v1025_v27 = vadd.s32 120, %v1871_v2  ;;  %vm1075_vm0 = vmand %vm1058_vm13, %vm1062_vm6 }
 0x278   : > { %v1484_v37 = vpop.f32.mrf.mxu0 }
 0x279   : > { %996 = vst [vmem:[%s1756_s24 + $0x18] sm:$0xff] %v980_v34  ;;  %v979_v41 = vmax.f32 %v909_v35, 0.0  ;;  %v924_v42 = vadd.f32 %v1484_v37, %v1887_v10  ;;  %v1128_v47 = vadd.f32 %v1113_v40, %v1112_v33  ;;  %v1115_v55 = vmul.f32 %v1317_v43, %v980_v34 }
 0x27a   : > { %v918_v44 = vpop.f32.mrf.mxu0  ;;  %v1042_v34 = vadd.s32 %v1875_v4, %v1024_v18  ;;  %v1043_v40 = vadd.s32 %v1875_v4, %v1025_v27 }
 0x27b   : > { %995 = vst [vmem:[%s1756_s24 + $0x10] sm:$0xff] %v979_v41  ;;  %v1114_v48 = vmul.f32 %v1316_v36, %v979_v41  ;;  %v982_v49 = vmax.f32 %v924_v42, 0.0  ;;  %v919_v50 = vadd.f32 %v1887_v10, %v918_v44 }
 0x27c   : > { %v1487_v52 = vpop.f32.mrf.mxu0  ;;  %vm1060_vm1 = vcmp.lt.s32.totalorder %v1042_v34, 200  ;;  %vm1061_vm3 = vcmp.lt.s32.totalorder %v1043_v40, 200 }
 0x27d   : > { %v1129_v56 = vadd.f32 %v1128_v47, %v1114_v48  ;;  %998 = vst [vmem:[%s1756_s24 + $0x28] sm:$0xff] %v982_v49  ;;  %v981_v57 = vmax.f32 %v919_v50, 0.0  ;;  %v934_v58 = vadd.f32 %v1487_v52, %v1887_v10  ;;  %v1117_v11 = vmul.f32 %v1319_v59, %v982_v49  ;;  %vm1077_vm4 = vmand %vm1060_vm1, %vm1062_vm6 }
 0x27e   : > { %v928_v60 = vpop.f32.mrf.mxu0  ;;  %v1326_v50 = vsel %vm1075_vm0, 1.0, %v1647_v22  ;;  %vm1078_vm5 = vmand %vm1061_vm3, %vm1062_vm6  ;;  %v1328_v62 = vsel %vm1077_vm4, 1.0, %v1647_v22 }
 0x27f   : > { %997 = vst [vmem:[%s1756_s24 + $0x20] sm:$0xff] %v981_v57  ;;  %v1116_v63 = vmul.f32 %v1318_v51, %v981_v57  ;;  %v1130_v0 = vadd.f32 %v1129_v56, %v1115_v55  ;;  %v984_v1 = vmax.f32 %v934_v58, 0.0  ;;  %v929_v3 = vadd.f32 %v1887_v10, %v928_v60 }
 0x280   : > { %v1490_v6 = vpop.f32.mrf.mxu0  ;;  %v1327_v56 = vsel %vm1076_vm2, 1.0, %v1647_v22 }
 0x281   : > { %v1131_v12 = vadd.f32 %v1130_v0, %v1116_v63  ;;  %1000 = vst [vmem:[%s1756_s24 + $0x38] sm:$0xff] %v984_v1  ;;  %v983_v13 = vmax.f32 %v929_v3, 0.0  ;;  %v944_v14 = vadd.f32 %v1490_v6, %v1887_v10  ;;  %v1119_v28 = vmul.f32 %v1321_v15, %v984_v1 }
 0x282   : > { %v938_v16 = vpop.f32.mrf.mxu0  ;;  %v1329_v3 = vsel %vm1078_vm5, 1.0, %v1647_v22 }
 0x283   : > { %999 = vst [vmem:[%s1756_s24 + $0x30] sm:$0xff] %v983_v13  ;;  %v1118_v19 = vmul.f32 %v1320_v5, %v983_v13  ;;  %v1132_v20 = vadd.f32 %v1131_v12, %v1117_v11  ;;  %v986_v21 = vmax.f32 %v944_v14, 0.0  ;;  %v939_v23 = vadd.f32 %v1887_v10, %v938_v16 }
 0x284   : > { %v1493_v25 = vpop.f32.mrf.mxu0 }
 0x285   : > { %v1133_v29 = vadd.f32 %v1132_v20, %v1118_v19  ;;  %1002 = vst [vmem:[%s1756_s24 + $0x48] sm:$0xff] %v986_v21  ;;  %v985_v30 = vmax.f32 %v939_v23, 0.0  ;;  %v954_v31 = vadd.f32 %v1493_v25, %v1887_v10  ;;  %v1121_v41 = vmul.f32 %v1323_v32, %v986_v21 }
 0x286   : > { %v948_v33 = vpop.f32.mrf.mxu0 }
 0x287   : > { %1001 = vst [vmem:[%s1756_s24 + $0x40] sm:$0xff] %v985_v30  ;;  %v1120_v35 = vmul.f32 %v1322_v24, %v985_v30  ;;  %v1134_v2 = vadd.f32 %v1133_v29, %v1119_v28  ;;  %v988_v36 = vmax.f32 %v954_v31, 0.0  ;;  %v949_v37 = vadd.f32 %v1887_v10, %v948_v33 }
 0x288   : > { %v1496_v39 = vpop.f32.mrf.mxu0 }
 0x289   : > { %v1135_v42 = vadd.f32 %v1134_v2, %v1120_v35  ;;  %1004 = vst [vmem:[%s1756_s24 + $0x58] sm:$0xff] %v988_v36  ;;  %v987_v43 = vmax.f32 %v949_v37, 0.0  ;;  %v964_v44 = vadd.f32 %v1496_v39, %v1887_v10  ;;  %v1123_v52 = vmul.f32 %v1325_v45, %v988_v36 }
 0x28a   : > { %v958_v46 = vpop.f32.mrf.mxu0 }
 0x28b   : > { %1003 = vst [vmem:[%s1756_s24 + $0x50] sm:$0xff] %v987_v43  ;;  %v1122_v47 = vmul.f32 %v1324_v38, %v987_v43  ;;  %v1136_v48 = vadd.f32 %v1135_v42, %v1121_v41  ;;  %v990_v4 = vmax.f32 %v964_v44, 0.0  ;;  %v959_v49 = vadd.f32 %v1887_v10, %v958_v46 }
 0x28c   : > { %v1499_v51 = vpop.f32.mrf.mxu0 }
 0x28d   : > { %v1137_v53 = vadd.f32 %v1136_v48, %v1122_v47  ;;  %1006 = vst [vmem:[%s1756_s24 + $0x68] sm:$0xff] %v990_v4  ;;  %v989_v54 = vmax.f32 %v959_v49, 0.0  ;;  %v974_v55 = vadd.f32 %v1499_v51, %v1887_v10  ;;  %v1125_v63 = vmul.f32 %v1327_v56, %v990_v4 }
 0x28e   : > { %v968_v57 = vpop.f32.mrf.mxu0 }
 0x28f   : > { %1005 = vst [vmem:[%s1756_s24 + $0x60] sm:$0xff] %v989_v54  ;;  %v1124_v58 = vmul.f32 %v1326_v50, %v989_v54  ;;  %v1138_v59 = vadd.f32 %v1137_v53, %v1123_v52  ;;  %v992_v60 = vmax.f32 %v974_v55, 0.0  ;;  %v969_v61 = vadd.f32 %v1887_v10, %v968_v57 }
 0x291   : > { %v1139_v0 = vadd.f32 %v1138_v59, %v1124_v58  ;;  %1008 = vst [vmem:[%s1756_s24 + $0x78] sm:$0xff] %v992_v60  ;;  %v991_v1 = vmax.f32 %v969_v61, 0.0  ;;  %v1127_v7 = vmul.f32 %v1329_v3, %v992_v60 }
 0x293   : > { %1007 = vst [vmem:[%s1756_s24 + $0x70] sm:$0xff] %v991_v1  ;;  %v1126_v5 = vmul.f32 %v1328_v62, %v991_v1  ;;  %v1140_v6 = vadd.f32 %v1139_v0, %v1125_v63 }
 0x295   : > { %v1141_v9 = vadd.f32 %v1140_v6, %v1126_v5 }
 0x297   : > { %v1142_v10 = vadd.f32 %v1141_v9, %v1127_v7 }
 0x299   : > { %1143 = vadd.xlane.f32.xlu0 %v1142_v10 }
 0x29a   : > { %1569 = shalt.err (!%p1566_p7)
}
 0x29b   : > { %s1570_s17 = scalar_lea.hbm %s2013_s19, 2048  ;;  %s1574_s12 = scalar_lea.hbm %s2078_s7, 4096 }
 0x29c   : > { %p1571_p8 = scmp.ne.s32.totalorder %s2013_s19, %s1570_s17  ;;  %p1575_p11 = scmp.lt.s32.totalorder %s2013_s19, %s2078_s7 }
 0x29d   : > { %p1576_p12 = scmp.lt.s32.totalorder %s1574_s12, %s1570_s17 }
 0x29e   : > { %p1572_p9 = pnand %p1571_p8, %p1737_p5 }
 0x29f   : > { %p1577_p13 = por %p1576_p12, %p1575_p11 }
 0x2a0   : > { %p1573_p10 = pneg %p1572_p9 }
 0x2a2   : > { %p1578_p0 = pnand %p1577_p13, %p1573_p10 }
 0x2a4   : > { %1581 = shalt.err (!%p1578_p0)
}
 0x2a5   : > { %s1649_s22 = smov 128   ;;  %s1650_s23 = smov 8   ;;  %v1111_v16 = vld [vmem:[#allocation4] sm:$0x1]  ;;  %vm1154_vm6 = vcmask 0  }
 0x2a6   : > { %1506 = dma.vmem_to_hbm [thread:$0]  (%p1737_p5), %s2016_s20, 2048, %s2013_s19, %s2020_s21, %s1649_s22, %s1649_s22, %s1650_s23  }
 0x2a7   : > { %s1651_s25 = smov [#allocation4]  }
 0x2a8   : > { %s1184_s26 = sshll.u32 %s1651_s25, 4  ;;  %s1185_s26 = int_to_ptr.vmem [resolvable:$true] %s1184_s26 }
 0x2a9   : > { %s1582_s15 = scalar_lea.vmem %s1185_s26, 16  ;;  %s1588_s19 = scalar_lea.vmem %s1185_s26, 32 }
 0x2aa   : > { %p1583_p5 = scmp.ne.s32.totalorder %s1185_s26, %s1582_s15  ;;  %p1589_p4 = scmp.lt.s32.totalorder %s1185_s26, %s1185_s26 }
 0x2ab   : > { %p1590_p7 = scmp.lt.s32.totalorder %s1588_s19, %s1582_s15 }
 0x2ac   : > { %p1584_p1 = pnand %p1583_p5, %p193_p2 }
 0x2ad   : > { %p1591_p8 = por %p1590_p7, %p1589_p4 }
 0x2ae   : > { %p1585_p3 = pneg %p1584_p1 }
 0x2b0   : > { %p1592_p9 = pnand %p1591_p8, %p1585_p3 }
 0x322   : > { %v1144_v8 = vpop.xlane.xlu0 %1143 }
 0x323   : > { %v1145_v22 = vrot.slane %v1144_v8, 4 }
 0x325   : > { %v1146_v11 = vadd.f32 %v1145_v22, %v1144_v8 }
 0x327   : > { %v1147_v12 = vrot.slane %v1146_v11, 2 }
 0x329   : > { %v1148_v13 = vadd.f32 %v1147_v12, %v1146_v11 }
 0x32b   : > { %v1149_v14 = vrot.slane %v1148_v13, 1 }
 0x32d   : > { %v1150_v15 = vadd.f32 %v1149_v14, %v1148_v13 }
 0x32f   : > { %1504 = vpush %v1150_v15 }
 0x360   : > { %s1505_s17 = spop %1504 }
 0x361   : > { %v1152_v17 = vstv %s1505_s17 }
 0x362   : > { %v1153_v18 = vadd.f32 %v1152_v17, %v1111_v16 }
 0x364   : > { %1155 = vst.msk [vmem:[#allocation4] sm:$0x1] %vm1154_vm6, %v1153_v18 }
 0x365   : > { %1595 = shalt.err (!%p1592_p9)
}
 0x366   : > { %1508 = dma.vmem_to_hbm [thread:$0]  (%p193_p2), %s1185_s26, 16, %s2079_s8, [#allocation5]  }
 0x367   : > { %1623 = dma.done.wait (%p193_p2), [#allocation5], 16  }
 0x368   : > { %1625 = vsyncadd (%p193_p2), [#allocation5], 4294967280 }
 0x369 PF: > { %p1518_p10 = scmp.ge.s32.totalorder %s1644_s30, 2  ;;  %s1200_s24 = sand.u32 1, %s1632_s27  }
 0x36a   : > { %s1201_s10 = scalar_lea.sflag [#allocation3], %s1200_s24 }
 0x36b   : > { %p1513_p11 = pnand %p1518_p10, %p1741_p6 }
 0x36d   : > { %p1514_p12 = pneg %p1513_p11 }
 0x36f   : > { %1627 = dma.done.wait (%p1514_p12), %s1201_s10, 2048  }
 0x370   : > { %1629 = vsyncadd (%p1514_p12), %s1201_s10, 4294965248  ;;  %p20_p13 = scmp.ge.s32.totalorder %s1722_s11, 4   ;;  %s2082_s27 = smov %s1636_s28 }
 0x371   : > { %s2083_s28 = smov %s1640_s29  ;;  %s2084_s29 = smov %s1733_s14 }
 0x372   : > { %s2085_s30 = smov %s1722_s11  ;;  %22 = sbr.rel (!%p20_p13) target bundleno = 4 (0x4), region = 95 }
 0x377   :  { %1206 = vsyncpa [#allocation3], 1 }
 0x378   :  { %1208 = vsyncpa [#allocation3 + $0x1], 1 }
 0x379   :  { %1209 = vsyncpa [#allocation5], 1 }

</bundles_post_ra>
